<compile_context>
chip_gen: v6e
topology: v6e:2x2x1
jax: 0.10.0
libtpu: 0.0.40
codegen_flags: <defaults>
</compile_context>

<pallas_src>
import jax
import jax.numpy as jnp
from jax.experimental import pallas as pl
from jax.experimental.pallas import tpu as pltpu

_LANE = 128
_SUBLANE = 8


def _round_up(x, m):
    return ((x + m - 1) // m) * m


def _noise_adaptation_kernel(f_ref, w_ref, rl_ref, rd_ref, e_ref, h_ref):
    fv = f_ref[...]                                                    # [TB, C]
    wv = w_ref[...]                                                    # [TB, A]

    # local probs, annotator-flattened along lanes: [TB, TN]
    local_flat = jnp.dot(fv, rl_ref[...], preferred_element_type=jnp.float32)
    # (global - local), same layout: [TB, TN]
    diff_flat = jnp.dot(fv, rd_ref[...], preferred_element_type=jnp.float32)
    # w broadcast across the C lanes of each annotator block: [TB, TN]
    w_rep = jnp.dot(wv, e_ref[...], preferred_element_type=jnp.float32)

    # h = w*global + (1-w)*local  ==  local + w*(global - local)
    h_ref[...] = local_flat + w_rep * diff_flat


def _pick_tiles(B, C, A, n_pad, vmem_budget_bytes=40 << 20):
    """Pick (TB, TN, n_steps_N, const_bytes) with honest (8,128) accounting."""
    c_sub = _round_up(max(C, 1), _SUBLANE)     # sublane-padded rows of R_*
    a_sub = _round_up(max(A, 1), _SUBLANE)     # sublane-padded rows of E
    c_lane = _round_up(max(C, 1), _LANE)       # lane-padded f tile width
    a_lane = _round_up(max(A, 1), _LANE)       # lane-padded w tile width

    def const_bytes(tn, bufs):
        # R_local + R_diff (C rows each) + E (A rows), f32.
        return 4 * tn * (2 * c_sub + a_sub) * bufs

    # --- TN: keep constants resident if they fit comfortably, else stream. ---
    const_budget = min(16 << 20, vmem_budget_bytes // 2)
    if const_bytes(n_pad, 1) <= const_budget:
        tn, nn = n_pad, 1
    else:
        tn = (const_budget // (8 * (2 * c_sub + a_sub))) // _LANE * _LANE
        tn = int(min(max(tn, _LANE), n_pad))
        nn = pl.cdiv(n_pad, tn)

    const_total = const_bytes(tn, 1 if nn == 1 else 2)

    # --- TB: largest multiple of 8 fitting the remaining budget, but keep ---
    # --- >=2 (>=4 for larger B) grid steps along batch for megacore/overlap.
    per_row = 4 * 2 * (c_lane + a_lane + tn)          # double-buffered f, w, h
    remaining = max(vmem_budget_bytes - const_total, per_row * _SUBLANE)
    tb = max(_SUBLANE, (remaining // per_row) // _SUBLANE * _SUBLANE)

    min_steps = 4 if B >= 4 * _SUBLANE else 2
    cap = max(_SUBLANE, _round_up(pl.cdiv(B, min_steps), _SUBLANE))
    tb = int(min(tb, cap, 1024))
    if tb >= B:
        tb = B                                         # full batch in one block
    return tb, tn, nn, const_total


def noise_adaptation_forward(f, w, global_cm, local_cms):
    B, C = f.shape
    A = w.shape[1]
    assert global_cm.shape == (C, C)
    assert local_cms.shape == (A, C, C)

    f32 = jnp.float32
    f = f.astype(f32)
    w = w.astype(f32)
    G = global_cm.astype(f32)
    L = local_cms.astype(f32)

    n = A * C
    n_pad = _round_up(n, _LANE)

    # ---- host-side precomputation of constant, lane-dense RHS matrices ----
    # R_local[k, a*C + l] = L[a, k, l]
    r_local = jnp.transpose(L, (1, 0, 2)).reshape(C, n)
    # R_global[k, a*C + l] = G[k, l];  fold the blend: R_diff = R_global - R_local
    r_diff = jnp.tile(G, (1, A)) - r_local
    # E[a', a*C + l] = (a' == a)   (broadcasts w[b, a] over the C lanes of block a)
    e_expand = jnp.repeat(jnp.eye(A, dtype=f32), C, axis=1)

    # Zero-pad the lane axis to a multiple of 128 -> dense, unmasked output stores.
    pad = n_pad - n
    if pad:
        r_local = jnp.pad(r_local, ((0, 0), (0, pad)))
        r_diff = jnp.pad(r_diff, ((0, 0), (0, pad)))
        e_expand = jnp.pad(e_expand, ((0, 0), (0, pad)))

    tb, tn, nn, const_total = _pick_tiles(B, C, A, n_pad)
    nb = pl.cdiv(B, tb)
    grid = (nb, nn)

    streamed = 4 * 2 * tb * (_round_up(C, _LANE) + _round_up(A, _LANE) + tn)
    vmem_limit = int(min(streamed + const_total + (8 << 20), 56 << 20))

    cost = pl.CostEstimate(
        flops=int(2 * B * C * n_pad * 2 + 2 * B * A * n_pad + 2 * B * n_pad),
        transcendentals=0,
        bytes_accessed=int(4 * (B * C + B * A + 2 * C * n_pad + A * n_pad + B * n_pad)),
    )

    resident_consts = (nn == 1)

    def build(use_single_buffer_consts):
        def const_spec(rows):
            if use_single_buffer_consts and resident_consts:
                return pl.BlockSpec((rows, tn), lambda i, j: (0, j),
                                    pipeline_mode=pl.Buffered(1))
            return pl.BlockSpec((rows, tn), lambda i, j: (0, j))

        return pl.pallas_call(
            _noise_adaptation_kernel,
            out_shape=jax.ShapeDtypeStruct((B, n_pad), f32),
            grid=grid,
            in_specs=[
                pl.BlockSpec((tb, C), lambda i, j: (i, 0)),   # f  (streamed over batch)
                pl.BlockSpec((tb, A), lambda i, j: (i, 0)),   # w  (streamed over batch)
                const_spec(C),                                # R_local
                const_spec(C),                                # R_diff
                const_spec(A),                                # E
            ],
            out_specs=pl.BlockSpec((tb, tn), lambda i, j: (i, j)),  # lane-dense slab
            compiler_params=pltpu.CompilerParams(
                dimension_semantics=("parallel", "parallel"),
                vmem_limit_bytes=vmem_limit,
            ),
            cost_estimate=cost,
        )

    try:
        h_flat = build(True)(f, w, r_local, r_diff, e_expand)
        h_flat = jax.block_until_ready(h_flat)
    except Exception:
        # Fallback if this Pallas build rejects pipeline_mode=pl.Buffered(1).
        h_flat = build(False)(f, w, r_local, r_diff, e_expand)

    return h_flat[:, :n].reshape(B, A, C)


def init_params(n_class, n_annotator):
    # Matches the PyTorch module __init__:
    #   global_confusion_matrix   = eye(C) * 2
    #   local_confusion_matrices  = stack([eye(C) * 2] * A)
    global_cm = jnp.eye(n_class, dtype=jnp.float32) * 2.0
    local_cms = jnp.tile(
        (jnp.eye(n_class, dtype=jnp.float32) * 2.0)[None], (n_annotator, 1, 1)
    )
    return global_cm, local_cms


if __name__ == "__main__":
    B, C, A = 16, 8, 4  # batch, n_class, n_annotator

    key = jax.random.PRNGKey(0)
    kf, kw = jax.random.split(key)
    f = jax.nn.softmax(jax.random.normal(kf, (B, C), dtype=jnp.float32), axis=-1)
    w = jax.nn.sigmoid(jax.random.normal(kw, (B, A), dtype=jnp.float32))

    global_cm, local_cms = init_params(C, A)

    h = noise_adaptation_forward(f, w, global_cm, local_cms)
    h = jax.block_until_ready(h)

    # Pure-JAX reference.
    gp_ref = f @ global_cm
    lp_ref = jnp.einsum('ik,jkl->ijl', f, local_cms)
    h_ref = w[:, :, None] * gp_ref[:, None, :] + (1.0 - w[:, :, None]) * lp_ref

    assert h.shape == (B, A, C)
    assert jnp.allclose(h, h_ref, atol=1e-5, rtol=1e-5)

    print("KERNEL_OK")
</pallas_src>

<mosaic_0001>
module attributes {stable_mosaic.version = 11 : i64} {
  func.func @_noise_adaptation_kernel(%arg0: i32, %arg1: i32, %arg2: memref<8x8xf32, #tpu.memory_space<vmem>>, %arg3: memref<8x4xf32, #tpu.memory_space<vmem>>, %arg4: memref<8x128xf32, #tpu.memory_space<vmem>>, %arg5: memref<8x128xf32, #tpu.memory_space<vmem>>, %arg6: memref<4x128xf32, #tpu.memory_space<vmem>>, %arg7: memref<8x128xf32, #tpu.memory_space<vmem>>) attributes {dimension_semantics = [#tpu.dimension_semantics<parallel>, #tpu.dimension_semantics<parallel>], iteration_bounds = array<i64: 2, 1>, scalar_prefetch = 0 : i64, scratch_operands = 0 : i64, tpu.core_type = #tpu.core_type<tc>, window_params = [{transform_indices = @transform_0, window_bounds = array<i64: 8, 8>}, {transform_indices = @transform_1, window_bounds = array<i64: 8, 4>}, {pipeline_mode = #tpu.pipeline_mode<synchronous>, transform_indices = @transform_2, window_bounds = array<i64: 8, 128>}, {pipeline_mode = #tpu.pipeline_mode<synchronous>, transform_indices = @transform_3, window_bounds = array<i64: 8, 128>}, {pipeline_mode = #tpu.pipeline_mode<synchronous>, transform_indices = @transform_4, window_bounds = array<i64: 4, 128>}, {transform_indices = @transform_5, window_bounds = array<i64: 8, 128>}]} {
    %c0 = arith.constant 0 : index
    %c0_0 = arith.constant 0 : index
    %0 = vector.load %arg2[%c0, %c0_0] : memref<8x8xf32, #tpu.memory_space<vmem>>, vector<8x8xf32>
    %c0_1 = arith.constant 0 : index
    %c0_2 = arith.constant 0 : index
    %1 = vector.load %arg3[%c0_1, %c0_2] : memref<8x4xf32, #tpu.memory_space<vmem>>, vector<8x4xf32>
    %c0_3 = arith.constant 0 : index
    %c0_4 = arith.constant 0 : index
    %2 = vector.load %arg4[%c0_3, %c0_4] : memref<8x128xf32, #tpu.memory_space<vmem>>, vector<8x128xf32>
    %cst = arith.constant dense<0.000000e+00> : vector<8x128xf32>
    %3 = tpu.matmul %0, %2, %cst {dimension_numbers = #tpu.dot_dimension_numbers<[1], [0], [0], [1], [0, 0, 1, 1], [], []>} : vector<8x8xf32>, vector<8x128xf32>, vector<8x128xf32> -> vector<8x128xf32>
    %c0_5 = arith.constant 0 : index
    %c0_6 = arith.constant 0 : index
    %4 = vector.load %arg5[%c0_5, %c0_6] : memref<8x128xf32, #tpu.memory_space<vmem>>, vector<8x128xf32>
    %cst_7 = arith.constant dense<0.000000e+00> : vector<8x128xf32>
    %5 = tpu.matmul %0, %4, %cst_7 {dimension_numbers = #tpu.dot_dimension_numbers<[1], [0], [0], [1], [0, 0, 1, 1], [], []>} : vector<8x8xf32>, vector<8x128xf32>, vector<8x128xf32> -> vector<8x128xf32>
    %c0_8 = arith.constant 0 : index
    %c0_9 = arith.constant 0 : index
    %6 = vector.load %arg6[%c0_8, %c0_9] : memref<4x128xf32, #tpu.memory_space<vmem>>, vector<4x128xf32>
    %cst_10 = arith.constant dense<0.000000e+00> : vector<8x128xf32>
    %7 = tpu.matmul %1, %6, %cst_10 {dimension_numbers = #tpu.dot_dimension_numbers<[1], [0], [0], [1], [0, 0, 1, 1], [], []>} : vector<8x4xf32>, vector<4x128xf32>, vector<8x128xf32> -> vector<8x128xf32>
    %8 = arith.mulf %7, %5 : vector<8x128xf32>
    %9 = arith.addf %3, %8 : vector<8x128xf32>
    %c0_11 = arith.constant 0 : index
    %c0_12 = arith.constant 0 : index
    %10 = vector.load %arg7[%c0_11, %c0_12] : memref<8x128xf32, #tpu.memory_space<vmem>>, vector<8x128xf32>
    tpu.vector_store %arg7[%c0_11, %c0_12], %9 {strides = array<i32>} : memref<8x128xf32, #tpu.memory_space<vmem>>, vector<8x128xf32>,
    return
  }
  func.func @transform_0(%arg0: i32, %arg1: i32) -> (i32, i32) {
    %c0_i32 = arith.constant 0 : i32
    %c0_i32_0 = arith.constant 0 : i32
    return %arg0, %c0_i32 : i32, i32
  }
  func.func @transform_1(%arg0: i32, %arg1: i32) -> (i32, i32) {
    %c0_i32 = arith.constant 0 : i32
    %c0_i32_0 = arith.constant 0 : i32
    return %arg0, %c0_i32 : i32, i32
  }
  func.func @transform_2(%arg0: i32, %arg1: i32) -> (i32, i32) {
    %c0_i32 = arith.constant 0 : i32
    %c0_i32_0 = arith.constant 0 : i32
    return %c0_i32, %arg1 : i32, i32
  }
  func.func @transform_3(%arg0: i32, %arg1: i32) -> (i32, i32) {
    %c0_i32 = arith.constant 0 : i32
    %c0_i32_0 = arith.constant 0 : i32
    return %c0_i32, %arg1 : i32, i32
  }
  func.func @transform_4(%arg0: i32, %arg1: i32) -> (i32, i32) {
    %c0_i32 = arith.constant 0 : i32
    %c0_i32_0 = arith.constant 0 : i32
    return %c0_i32, %arg1 : i32, i32
  }
  func.func @transform_5(%arg0: i32, %arg1: i32) -> (i32, i32) {
    %c0_i32 = arith.constant 0 : i32
    return %arg0, %arg1 : i32, i32
  }
}

module attributes {stable_mosaic.version = 11 : i64} {
  func.func @_noise_adaptation_kernel(%arg0: i32, %arg1: i32, %arg2: memref<8x8xf32, #tpu.memory_space<vmem>>, %arg3: memref<8x4xf32, #tpu.memory_space<vmem>>, %arg4: memref<8x128xf32, #tpu.memory_space<vmem>>, %arg5: memref<8x128xf32, #tpu.memory_space<vmem>>, %arg6: memref<4x128xf32, #tpu.memory_space<vmem>>, %arg7: memref<8x128xf32, #tpu.memory_space<vmem>>) attributes {dimension_semantics = [#tpu.dimension_semantics<parallel>, #tpu.dimension_semantics<parallel>], iteration_bounds = array<i64: 2, 1>, scalar_prefetch = 0 : i64, scratch_operands = 0 : i64, tpu.core_type = #tpu.core_type<tc>, window_params = [{transform_indices = @transform_0, window_bounds = array<i64: 8, 8>}, {transform_indices = @transform_1, window_bounds = array<i64: 8, 4>}, {transform_indices = @transform_2, window_bounds = array<i64: 8, 128>}, {transform_indices = @transform_3, window_bounds = array<i64: 8, 128>}, {transform_indices = @transform_4, window_bounds = array<i64: 4, 128>}, {transform_indices = @transform_5, window_bounds = array<i64: 8, 128>}]} {
    %c0 = arith.constant 0 : index
    %c0_0 = arith.constant 0 : index
    %0 = vector.load %arg2[%c0, %c0_0] : memref<8x8xf32, #tpu.memory_space<vmem>>, vector<8x8xf32>
    %c0_1 = arith.constant 0 : index
    %c0_2 = arith.constant 0 : index
    %1 = vector.load %arg3[%c0_1, %c0_2] : memref<8x4xf32, #tpu.memory_space<vmem>>, vector<8x4xf32>
    %c0_3 = arith.constant 0 : index
    %c0_4 = arith.constant 0 : index
    %2 = vector.load %arg4[%c0_3, %c0_4] : memref<8x128xf32, #tpu.memory_space<vmem>>, vector<8x128xf32>
    %cst = arith.constant dense<0.000000e+00> : vector<8x128xf32>
    %3 = tpu.matmul %0, %2, %cst {dimension_numbers = #tpu.dot_dimension_numbers<[1], [0], [0], [1], [0, 0, 1, 1], [], []>} : vector<8x8xf32>, vector<8x128xf32>, vector<8x128xf32> -> vector<8x128xf32>
    %c0_5 = arith.constant 0 : index
    %c0_6 = arith.constant 0 : index
    %4 = vector.load %arg5[%c0_5, %c0_6] : memref<8x128xf32, #tpu.memory_space<vmem>>, vector<8x128xf32>
    %cst_7 = arith.constant dense<0.000000e+00> : vector<8x128xf32>
    %5 = tpu.matmul %0, %4, %cst_7 {dimension_numbers = #tpu.dot_dimension_numbers<[1], [0], [0], [1], [0, 0, 1, 1], [], []>} : vector<8x8xf32>, vector<8x128xf32>, vector<8x128xf32> -> vector<8x128xf32>
    %c0_8 = arith.constant 0 : index
    %c0_9 = arith.constant 0 : index
    %6 = vector.load %arg6[%c0_8, %c0_9] : memref<4x128xf32, #tpu.memory_space<vmem>>, vector<4x128xf32>
    %cst_10 = arith.constant dense<0.000000e+00> : vector<8x128xf32>
    %7 = tpu.matmul %1, %6, %cst_10 {dimension_numbers = #tpu.dot_dimension_numbers<[1], [0], [0], [1], [0, 0, 1, 1], [], []>} : vector<8x4xf32>, vector<4x128xf32>, vector<8x128xf32> -> vector<8x128xf32>
    %8 = arith.mulf %7, %5 : vector<8x128xf32>
    %9 = arith.addf %3, %8 : vector<8x128xf32>
    %c0_11 = arith.constant 0 : index
    %c0_12 = arith.constant 0 : index
    %10 = vector.load %arg7[%c0_11, %c0_12] : memref<8x128xf32, #tpu.memory_space<vmem>>, vector<8x128xf32>
    tpu.vector_store %arg7[%c0_11, %c0_12], %9 {strides = array<i32>} : memref<8x128xf32, #tpu.memory_space<vmem>>, vector<8x128xf32>,
    return
  }
  func.func @transform_0(%arg0: i32, %arg1: i32) -> (i32, i32) {
    %c0_i32 = arith.constant 0 : i32
    %c0_i32_0 = arith.constant 0 : i32
    return %arg0, %c0_i32 : i32, i32
  }
  func.func @transform_1(%arg0: i32, %arg1: i32) -> (i32, i32) {
    %c0_i32 = arith.constant 0 : i32
    %c0_i32_0 = arith.constant 0 : i32
    return %arg0, %c0_i32 : i32, i32
  }
  func.func @transform_2(%arg0: i32, %arg1: i32) -> (i32, i32) {
    %c0_i32 = arith.constant 0 : i32
    %c0_i32_0 = arith.constant 0 : i32
    return %c0_i32, %arg1 : i32, i32
  }
  func.func @transform_3(%arg0: i32, %arg1: i32) -> (i32, i32) {
    %c0_i32 = arith.constant 0 : i32
    %c0_i32_0 = arith.constant 0 : i32
    return %c0_i32, %arg1 : i32, i32
  }
  func.func @transform_4(%arg0: i32, %arg1: i32) -> (i32, i32) {
    %c0_i32 = arith.constant 0 : i32
    %c0_i32_0 = arith.constant 0 : i32
    return %c0_i32, %arg1 : i32, i32
  }
  func.func @transform_5(%arg0: i32, %arg1: i32) -> (i32, i32) {
    %c0_i32 = arith.constant 0 : i32
    return %arg0, %arg1 : i32, i32
  }
}

</mosaic_0001>

<bundles_post_ra>
// kernel: tpu_custom_call.1
= control target key start
LH: loop header
LB: loop body
LE: loop exit
PB: predicated region body
PF: predicated region fallthrough
CT: control target
= control target key end

     0   :  { %10 = vsyncpa [#allocation3], 0  ;;  %s999_s0 = inlined_call_operand.vmem [shape: f32[16,8], index: 0, kind: input, shape index: {}]   ;;  %s1000_s1 = inlined_call_operand.vmem [shape: f32[16,4], index: 1, kind: input, shape index: {}]   ;;  %s1001_s2 = inlined_call_operand.vmem [shape: f32[8,128], index: 2, kind: input, shape index: {}]   ;;  %s1002_s3 = inlined_call_operand.vmem [shape: f32[8,128], index: 3, kind: input, shape index: {}]   ;;  %s1003_s4 = inlined_call_operand.vmem [shape: f32[4,128], index: 4, kind: input, shape index: {}]   ;;  %s1004_s5 = inlined_call_operand.hbm [shape: f32[16,128], index: 5, kind: output, shape index: {}]  }
   0x1   :  { %12 = vsyncpa [#allocation3 + $0x1], 0  ;;  %s879_s18 = smov 0   ;;  %s881_s19 = smov 0  }
   0x2   :  { %s883_s20 = smov 0   ;;  %s885_s21 = smov 0  }
   0x3   :  { %s887_s22 = smov 0   ;;  %s889_s23 = smov 0  }
   0x4 LB: > { %s671_s24 = sadd.s32 4294967295, %s844_s23   ;;  %s672_s25 = sadd.s32 4294967294, %s844_s23   ;;  %s844_s23 = sphi %s889_s23, %s18_s23   ;;  %s840_s22 = sphi %s887_s22, %s1011_s22   ;;  %s836_s21 = sphi %s885_s21, %s1010_s21   ;;  %s832_s20 = sphi %s883_s20, %s1009_s20   ;;  %s828_s19 = sphi %s881_s19, %s1008_s19   ;;  %s824_s18 = sphi %s879_s18, %s1007_s18  }
   0x5   : > { %s30_s26 = sadd.s32 1, %s840_s22  ;;  %s169_s27 = sadd.s32 1, %s832_s20 }
   0x6   : > { %p32_p0 = scmp.ge.s32.totalorder %s30_s26, 2  ;;  %p179_p1 = scmp.ne.s32.totalorder %s832_s20, %s828_s19 }
   0x7   : > { %p180_p2 = scmp.eq.s32.totalorder %s671_s24, 1  ;;  %p185_p3 = scmp.ne.s32.totalorder %s828_s19, %s824_s18 }
   0x8   : > { %s1013_s26 = smov (%p32_p0, %s30_s26), 0  ;;  %p186_p5 = scmp.eq.s32.totalorder %s672_s25, 1 }
   0x9   : > { %p919_p4 = por %p180_p2, %p179_p1  ;;  %s164_s29 = ssub.s32 %s840_s22, %s1013_s26 }
   0xa   : > { %p678_p6 = scmp.ge.s32.totalorder %s844_s23, 1  ;;  %p167_p7 = scmp.eq.s32.totalorder %s164_s29, 0 }
   0xb   : > { %p926_p8 = por %p186_p5, %p185_p3  ;;  %p239_p9 = scmp.lt.s32.totalorder %s844_s23, 3 }
   0xc   : > { %s932_s6 = scalar_select %p167_p7, %s832_s20, %s169_s27  }
   0xd   : > { %p240_p10 = pnand %p678_p6, %p239_p9 }
   0xe   : > { %p282_p11 = scmp.lt.s32.totalorder (!%p240_p10), %s836_s21, 1  ;;  %s279_s29 = sand.u32 (!%p240_p10), 1, %s828_s19  }
   0xf   : > { %243 = sbr.rel (%p240_p10) target bundleno = 237 (0xed), region = 40  ;;  %s679_s7 = sshll.u32 (!%p240_p10), %s279_s29, 3 }
  0x10   : > { %s687_s8 = sshll.u32 (!%p240_p10), %s836_s21, 7  ;;  %s281_s9 = scalar_lea.vmem (!%p240_p10), [#allocation2], %s679_s7 }
  0x11   : > { %s546_s10 = sshll.u32 (!%p240_p10), %s281_s9, 4  ;;  %s959_s13 = scalar_lea.hbm (!%p240_p10), %s1004_s5, %s687_s8  ;;  %s547_s10 = int_to_ptr.vmem [resolvable:$true] %s546_s10 }
  0x12   : > { %s532_s14 = scalar_lea.sflag (!%p240_p10), [#allocation3], %s279_s29 }
  0x14   : > { %v305_v0 = vld [vmem:[%s1002_s3] sm:$0xff]  ;;  %vm385_vm0 = vcmask 1043456   ;;  %v846_v2 = vmov 0.0   ;;  %vm847_vm1 = vmmov 0   ;;  %s283_s11 = scalar_select %p282_p11, %s836_s21, 1  ;;  %vm306_vm2 = vcmask 64512  }
  0x15   : > { %v380_v1 = vld [vmem:[%s1003_s4] sm:$0xf]  ;;  %696 = vmatprep.subr.mxu0 %v846_v2  ;;  %701 = vmatprep.subr.mxu1 %v846_v2  ;;  %vm381_vm3 = vcmask 31744   ;;  %s848_s21 = smov [#allocation2]  }
  0x16   : > { %697 = vmatpush3.msra.mxu0 %v305_v0  ;;  %698 = vmatprep.mubr.msk.f32.mxu0 %vm847_vm1, %v846_v2  ;;  %s680_s12 = sshll.u32 %s283_s11, 3  ;;  %v304_v3 = vld [vmem:[%s1001_s2] sm:$0xff]  ;;  %s772_s16 = sshll.u32 %s848_s21, 4  ;;  %s773_s16 = int_to_ptr.vmem [resolvable:$false] %s772_s16 }
  0x17   : > { %702 = vmatpush3.msk.msra.mxu1 %vm385_vm0, %v380_v1  ;;  %703 = vmatprep.mubr.msk.f32.mxu1 %vm847_vm1, %v846_v2  ;;  %s285_s15 = scalar_lea.vmem %s999_s0, %s680_s12  ;;  %s289_s24 = scalar_lea.vmem %s1000_s1, %s680_s12 }
  0x18   : > { %706 = vmatprep.subr.mxu0 %v846_v2  ;;  %v302_v4 = vld [vmem:[%s285_s15] sm:$0xff]  ;;  %s768_s15 = scalar_lea.vmem %s547_s10, 128  ;;  %s774_s17 = scalar_lea.vmem %s773_s16, 256 }
  0x19   : > { %v303_v5 = vld [vmem:[%s289_s24] sm:$0xff]  ;;  %699 = vmatmul.mubr.msk.f32.vlgmr.msra.gmra.mxu0 %vm306_vm2, %v302_v4  ;;  %p769_p12 = scmp.ne.s32.totalorder %s547_s10, %s768_s15  ;;  %p775_p1 = scmp.lt.s32.totalorder %s547_s10, %s773_s16 }
  0x1a   : > { %704 = vmatmul.mubr.msk.f32.vlgmr.msra.gmra.mxu1 %vm381_vm3, %v303_v5  ;;  %707 = vmatpush3.msra.mxu0 %v304_v3  ;;  %p776_p2 = scmp.lt.s32.totalorder %s774_s17, %s768_s15 }
  0x1b   : > { %708 = vmatprep.mubr.msk.f32.mxu0 %vm847_vm1, %v846_v2  ;;  %p770_p13 = pnand %p769_p12, %p919_p4 }
  0x1c   : > { %p777_p3 = por %p776_p2, %p775_p1 }
  0x1d   : > { %709 = vmatmul.mubr.msk.f32.vlgmr.msra.gmra.mxu0 %vm306_vm2, %v302_v4  ;;  %p771_p0 = pneg %p770_p13 }
  0x1f   : > { %p778_p5 = pnand %p777_p3, %p771_p0 }
  0xd9   : > { %v376_v6 = vpop.f32.mrf.mxu0 }
  0xda   : > { %v455_v7 = vpop.f32.mrf.mxu1 }
  0xdb   : > { %v700_v8 = vpop.f32.mrf.mxu0  ;;  %v459_v10 = vmul.f32 %v455_v7, %v376_v6 }
  0xdc   : > { %v705_v9 = vpop.f32.mrf.mxu1 }
  0xdd   : > { %v526_v11 = vpop.f32.mrf.mxu0 }
  0xde   : > { %v527_v12 = vadd.f32 %v526_v11, %v459_v10 }
  0xdf   : > { %v710_v13 = vpop.f32.mrf.mxu0 }
  0xe0   : > { %530 = vst [vmem:[%s281_s9] sm:$0xff] %v527_v12 }
  0xe1   : > { %781 = shalt.err (!%p778_p5)
}
  0xe2   : > { %s782_s24 = scalar_lea.hbm %s959_s13, 128  ;;  %s786_s29 = scalar_lea.hbm %s1004_s5, 256 }
  0xe3   : > { %p783_p6 = scmp.ne.s32.totalorder %s959_s13, %s782_s24  ;;  %p787_p10 = scmp.lt.s32.totalorder %s959_s13, %s1004_s5 }
  0xe4   : > { %p788_p11 = scmp.lt.s32.totalorder %s786_s29, %s782_s24 }
  0xe5   : > { %p784_p7 = pnand %p783_p6, %p919_p4 }
  0xe6   : > { %p789_p12 = por %p788_p11, %p787_p10 }
  0xe7   : > { %p785_p9 = pneg %p784_p7 }
  0xe9   : > { %p790_p13 = pnand %p789_p12, %p785_p9 }
  0xeb   : > { %793 = shalt.err (!%p790_p13)
}
  0xec   : > { %711 = dma.vmem_to_hbm [thread:$0]  (%p919_p4), %s547_s10, 128, %s959_s13, %s532_s14  }
  0xed PF: > { %p717_p0 = scmp.ge.s32.totalorder %s844_s23, 2  ;;  %s558_s9 = sand.u32 1, %s824_s18  }
  0xee   : > { %s559_s11 = scalar_lea.sflag [#allocation3], %s558_s9 }
  0xef   : > { %p714_p1 = pnand %p717_p0, %p926_p8 }
  0xf1   : > { %p715_p2 = pneg %p714_p1 }
  0xf3   : > { %819 = dma.done.wait (%p715_p2), %s559_s11, 128  }
  0xf4   : > { %821 = vsyncadd (%p715_p2), %s559_s11, 4294967168  ;;  %s18_s23 = sadd.s32 1, %s844_s23   ;;  %s1007_s18 = smov %s828_s19 }
  0xf5   : > { %p15_p3 = scmp.ge.s32.totalorder %s18_s23, 4   ;;  %s1008_s19 = smov %s832_s20 }
  0xf6   : > { %s1009_s20 = smov %s932_s6  ;;  %s1010_s21 = smov %s840_s22 }
  0xf7   : > { %s1011_s22 = smov %s1013_s26  ;;  %17 = sbr.rel (!%p15_p3) target bundleno = 4 (0x4), region = 87 }
  0xfc   :  { %564 = vsyncpa [#allocation3], 1 }
  0xfd   :  { %566 = vsyncpa [#allocation3 + $0x1], 1 }

// kernel: tpu_custom_call.1
= control target key start
LH: loop header
LB: loop body
LE: loop exit
PB: predicated region body
PF: predicated region fallthrough
CT: control target
= control target key end

     0   :  { %10 = vsyncpa [#allocation3], 0  ;;  %s999_s0 = inlined_call_operand.vmem [shape: f32[16,8], index: 0, kind: input, shape index: {}]   ;;  %s1000_s1 = inlined_call_operand.vmem [shape: f32[16,4], index: 1, kind: input, shape index: {}]   ;;  %s1001_s2 = inlined_call_operand.vmem [shape: f32[8,128], index: 2, kind: input, shape index: {}]   ;;  %s1002_s3 = inlined_call_operand.vmem [shape: f32[8,128], index: 3, kind: input, shape index: {}]   ;;  %s1003_s4 = inlined_call_operand.vmem [shape: f32[4,128], index: 4, kind: input, shape index: {}]   ;;  %s1004_s5 = inlined_call_operand.hbm [shape: f32[16,128], index: 5, kind: output, shape index: {}]  }
   0x1   :  { %12 = vsyncpa [#allocation3 + $0x1], 0  ;;  %s879_s18 = smov 0   ;;  %s881_s19 = smov 0  }
   0x2   :  { %s883_s20 = smov 0   ;;  %s885_s21 = smov 0  }
   0x3   :  { %s887_s22 = smov 0   ;;  %s889_s23 = smov 0  }
   0x4 LB: > { %s671_s24 = sadd.s32 4294967295, %s844_s23   ;;  %s672_s25 = sadd.s32 4294967294, %s844_s23   ;;  %s844_s23 = sphi %s889_s23, %s18_s23   ;;  %s840_s22 = sphi %s887_s22, %s1011_s22   ;;  %s836_s21 = sphi %s885_s21, %s1010_s21   ;;  %s832_s20 = sphi %s883_s20, %s1009_s20   ;;  %s828_s19 = sphi %s881_s19, %s1008_s19   ;;  %s824_s18 = sphi %s879_s18, %s1007_s18  }
   0x5   : > { %s30_s26 = sadd.s32 1, %s840_s22  ;;  %s169_s27 = sadd.s32 1, %s832_s20 }
   0x6   : > { %p32_p0 = scmp.ge.s32.totalorder %s30_s26, 2  ;;  %p179_p1 = scmp.ne.s32.totalorder %s832_s20, %s828_s19 }
   0x7   : > { %p180_p2 = scmp.eq.s32.totalorder %s671_s24, 1  ;;  %p185_p3 = scmp.ne.s32.totalorder %s828_s19, %s824_s18 }
   0x8   : > { %s1013_s26 = smov (%p32_p0, %s30_s26), 0  ;;  %p186_p5 = scmp.eq.s32.totalorder %s672_s25, 1 }
   0x9   : > { %p919_p4 = por %p180_p2, %p179_p1  ;;  %s164_s29 = ssub.s32 %s840_s22, %s1013_s26 }
   0xa   : > { %p678_p6 = scmp.ge.s32.totalorder %s844_s23, 1  ;;  %p167_p7 = scmp.eq.s32.totalorder %s164_s29, 0 }
   0xb   : > { %p926_p8 = por %p186_p5, %p185_p3  ;;  %p239_p9 = scmp.lt.s32.totalorder %s844_s23, 3 }
   0xc   : > { %s932_s6 = scalar_select %p167_p7, %s832_s20, %s169_s27  }
   0xd   : > { %p240_p10 = pnand %p678_p6, %p239_p9 }
   0xe   : > { %p282_p11 = scmp.lt.s32.totalorder (!%p240_p10), %s836_s21, 1  ;;  %s279_s29 = sand.u32 (!%p240_p10), 1, %s828_s19  }
   0xf   : > { %243 = sbr.rel (%p240_p10) target bundleno = 237 (0xed), region = 40  ;;  %s679_s7 = sshll.u32 (!%p240_p10), %s279_s29, 3 }
  0x10   : > { %s687_s8 = sshll.u32 (!%p240_p10), %s836_s21, 7  ;;  %s281_s9 = scalar_lea.vmem (!%p240_p10), [#allocation2], %s679_s7 }
  0x11   : > { %s546_s10 = sshll.u32 (!%p240_p10), %s281_s9, 4  ;;  %s959_s13 = scalar_lea.hbm (!%p240_p10), %s1004_s5, %s687_s8  ;;  %s547_s10 = int_to_ptr.vmem [resolvable:$true] %s546_s10 }
  0x12   : > { %s532_s14 = scalar_lea.sflag (!%p240_p10), [#allocation3], %s279_s29 }
  0x14   : > { %v305_v0 = vld [vmem:[%s1002_s3] sm:$0xff]  ;;  %vm385_vm0 = vcmask 1043456   ;;  %v846_v2 = vmov 0.0   ;;  %vm847_vm1 = vmmov 0   ;;  %s283_s11 = scalar_select %p282_p11, %s836_s21, 1  ;;  %vm306_vm2 = vcmask 64512  }
  0x15   : > { %v380_v1 = vld [vmem:[%s1003_s4] sm:$0xf]  ;;  %696 = vmatprep.subr.mxu0 %v846_v2  ;;  %701 = vmatprep.subr.mxu1 %v846_v2  ;;  %vm381_vm3 = vcmask 31744   ;;  %s848_s21 = smov [#allocation2]  }
  0x16   : > { %697 = vmatpush3.msra.mxu0 %v305_v0  ;;  %698 = vmatprep.mubr.msk.f32.mxu0 %vm847_vm1, %v846_v2  ;;  %s680_s12 = sshll.u32 %s283_s11, 3  ;;  %v304_v3 = vld [vmem:[%s1001_s2] sm:$0xff]  ;;  %s772_s16 = sshll.u32 %s848_s21, 4  ;;  %s773_s16 = int_to_ptr.vmem [resolvable:$false] %s772_s16 }
  0x17   : > { %702 = vmatpush3.msk.msra.mxu1 %vm385_vm0, %v380_v1  ;;  %703 = vmatprep.mubr.msk.f32.mxu1 %vm847_vm1, %v846_v2  ;;  %s285_s15 = scalar_lea.vmem %s999_s0, %s680_s12  ;;  %s289_s24 = scalar_lea.vmem %s1000_s1, %s680_s12 }
  0x18   : > { %706 = vmatprep.subr.mxu0 %v846_v2  ;;  %v302_v4 = vld [vmem:[%s285_s15] sm:$0xff]  ;;  %s768_s15 = scalar_lea.vmem %s547_s10, 128  ;;  %s774_s17 = scalar_lea.vmem %s773_s16, 256 }
  0x19   : > { %v303_v5 = vld [vmem:[%s289_s24] sm:$0xff]  ;;  %699 = vmatmul.mubr.msk.f32.vlgmr.msra.gmra.mxu0 %vm306_vm2, %v302_v4  ;;  %p769_p12 = scmp.ne.s32.totalorder %s547_s10, %s768_s15  ;;  %p775_p1 = scmp.lt.s32.totalorder %s547_s10, %s773_s16 }
  0x1a   : > { %704 = vmatmul.mubr.msk.f32.vlgmr.msra.gmra.mxu1 %vm381_vm3, %v303_v5  ;;  %707 = vmatpush3.msra.mxu0 %v304_v3  ;;  %p776_p2 = scmp.lt.s32.totalorder %s774_s17, %s768_s15 }
  0x1b   : > { %708 = vmatprep.mubr.msk.f32.mxu0 %vm847_vm1, %v846_v2  ;;  %p770_p13 = pnand %p769_p12, %p919_p4 }
  0x1c   : > { %p777_p3 = por %p776_p2, %p775_p1 }
  0x1d   : > { %709 = vmatmul.mubr.msk.f32.vlgmr.msra.gmra.mxu0 %vm306_vm2, %v302_v4  ;;  %p771_p0 = pneg %p770_p13 }
  0x1f   : > { %p778_p5 = pnand %p777_p3, %p771_p0 }
  0xd9   : > { %v376_v6 = vpop.f32.mrf.mxu0 }
  0xda   : > { %v455_v7 = vpop.f32.mrf.mxu1 }
  0xdb   : > { %v700_v8 = vpop.f32.mrf.mxu0  ;;  %v459_v10 = vmul.f32 %v455_v7, %v376_v6 }
  0xdc   : > { %v705_v9 = vpop.f32.mrf.mxu1 }
  0xdd   : > { %v526_v11 = vpop.f32.mrf.mxu0 }
  0xde   : > { %v527_v12 = vadd.f32 %v526_v11, %v459_v10 }
  0xdf   : > { %v710_v13 = vpop.f32.mrf.mxu0 }
  0xe0   : > { %530 = vst [vmem:[%s281_s9] sm:$0xff] %v527_v12 }
  0xe1   : > { %781 = shalt.err (!%p778_p5)
}
  0xe2   : > { %s782_s24 = scalar_lea.hbm %s959_s13, 128  ;;  %s786_s29 = scalar_lea.hbm %s1004_s5, 256 }
  0xe3   : > { %p783_p6 = scmp.ne.s32.totalorder %s959_s13, %s782_s24  ;;  %p787_p10 = scmp.lt.s32.totalorder %s959_s13, %s1004_s5 }
  0xe4   : > { %p788_p11 = scmp.lt.s32.totalorder %s786_s29, %s782_s24 }
  0xe5   : > { %p784_p7 = pnand %p783_p6, %p919_p4 }
  0xe6   : > { %p789_p12 = por %p788_p11, %p787_p10 }
  0xe7   : > { %p785_p9 = pneg %p784_p7 }
  0xe9   : > { %p790_p13 = pnand %p789_p12, %p785_p9 }
  0xeb   : > { %793 = shalt.err (!%p790_p13)
}
  0xec   : > { %711 = dma.vmem_to_hbm [thread:$0]  (%p919_p4), %s547_s10, 128, %s959_s13, %s532_s14  }
  0xed PF: > { %p717_p0 = scmp.ge.s32.totalorder %s844_s23, 2  ;;  %s558_s9 = sand.u32 1, %s824_s18  }
  0xee   : > { %s559_s11 = scalar_lea.sflag [#allocation3], %s558_s9 }
  0xef   : > { %p714_p1 = pnand %p717_p0, %p926_p8 }
  0xf1   : > { %p715_p2 = pneg %p714_p1 }
  0xf3   : > { %819 = dma.done.wait (%p715_p2), %s559_s11, 128  }
  0xf4   : > { %821 = vsyncadd (%p715_p2), %s559_s11, 4294967168  ;;  %s18_s23 = sadd.s32 1, %s844_s23   ;;  %s1007_s18 = smov %s828_s19 }
  0xf5   : > { %p15_p3 = scmp.ge.s32.totalorder %s18_s23, 4   ;;  %s1008_s19 = smov %s832_s20 }
  0xf6   : > { %s1009_s20 = smov %s932_s6  ;;  %s1010_s21 = smov %s840_s22 }
  0xf7   : > { %s1011_s22 = smov %s1013_s26  ;;  %17 = sbr.rel (!%p15_p3) target bundleno = 4 (0x4), region = 87 }
  0xfc   :  { %564 = vsyncpa [#allocation3], 1 }
  0xfd   :  { %566 = vsyncpa [#allocation3 + $0x1], 1 }

</bundles_post_ra>
